<compile_context>
chip_gen: v7x
topology: tpu7x:2x2x1
jax: 0.10.0
libtpu: 0.0.40
codegen_flags: <defaults>
</compile_context>

<pallas_src>
import jax
import jax.numpy as jnp
from jax.experimental import pallas as pl
from jax.experimental.pallas import tpu as pltpu

QUANTILES = (0.1, 0.5, 0.9)
THRESHOLD = 0.03
WEIGHT_FACTOR = 3.0

_LANES = 128                     # vreg lane width
_MAX_TILE_BYTES = 4 * 1024 * 1024  # per-input tile cap (8192 f32 rows / 16384 bf16 rows)
_VMEM_LIMIT_BYTES = 32 * 1024 * 1024


def _make_kernel(*, q_sum, q_count, threshold, weight_factor, inv_total,
                 tile_rows, valid_rows, needs_mask):
    """All arguments are plain Python numbers/bools -> baked in as literals."""

    def kernel(pred_ref, target_ref, out_ref, acc_ref):
        j = pl.program_id(0)

        @pl.when(j == 0)
        def _init():
            acc_ref[...] = jnp.zeros_like(acc_ref)

        pred = pred_ref[...].astype(jnp.float32)
        target = target_ref[...].astype(jnp.float32)
        e = target - pred
        w = jnp.where(jnp.abs(target) > threshold, weight_factor, 1.0)
        # sum over quantiles of the pinball loss, collapsed algebraically (exact).
        pinball_sum = q_sum * e + q_count * jnp.maximum(-e, 0.0)
        contrib = w * pinball_sum

        if needs_mask:
            # Last tile may extend past the array: zero out-of-range rows.
            row = jax.lax.broadcasted_iota(jnp.int32, (tile_rows, _LANES), 0)
            global_row = j * tile_rows + row
            contrib = jnp.where(global_row < valid_rows, contrib, 0.0)

        if tile_rows % 8 == 0:
            # Vreg-aligned accumulation: pure VPU adds, no per-tile XLU reduce.
            acc_ref[...] = acc_ref[...] + contrib.reshape(
                tile_rows // 8, 8, _LANES).sum(axis=0)
        else:
            # Tiny single-tile case (rows not a multiple of 8): one reduce is fine.
            acc_ref[0:1, 0:1] = acc_ref[0:1, 0:1] + jnp.sum(contrib, keepdims=True)

        @pl.when(j == pl.num_programs(0) - 1)
        def _finalize():
            out_ref[...] = jnp.sum(acc_ref[...], keepdims=True) * inv_total

    return kernel


def weighted_quantile_loss(pred, target, quantiles=QUANTILES,
                           threshold=THRESHOLD, weight_factor=WEIGHT_FACTOR):
    """pred, target: [batch_size, 1] (or [batch_size]) arrays. Returns scalar f32."""
    pred_flat = pred.reshape(-1)
    target_flat = target.reshape(-1)
    b = int(pred_flat.shape[0])
    q_count = len(quantiles)
    q_sum = float(sum(float(q) for q in quantiles))

    itemsize = jnp.dtype(pred.dtype).itemsize
    sub_mult = max(8, 8 * (4 // itemsize))   # 8 rows f32, 16 bf16, 32 int8/fp8

    # Lane-dense layout: [rows, 128]; pad only to the next multiple of 128.
    rows = -(-b // _LANES)
    pad = rows * _LANES - b
    if pad:
        # TODO(synk): for very large non-128-aligned batches, split the <=127
        # element tail into a tiny jnp reduction instead of this pad copy.
        pred_flat = jnp.pad(pred_flat, (0, pad))
        target_flat = jnp.pad(target_flat, (0, pad))
    pred2 = pred_flat.reshape(rows, _LANES)
    target2 = target_flat.reshape(rows, _LANES)

    max_rows = max(sub_mult,
                   (_MAX_TILE_BYTES // (_LANES * itemsize)) // sub_mult * sub_mult)
    if rows <= max_rows:
        tile_rows = rows            # full-array block: always a legal block shape
        n_tiles = 1
        needs_mask = False
    else:
        tile_rows = max_rows        # multiple of sub_mult (and of 8)
        n_tiles = -(-rows // tile_rows)
        needs_mask = (rows % tile_rows) != 0

    kernel = _make_kernel(
        q_sum=q_sum,
        q_count=float(q_count),
        threshold=float(threshold),
        weight_factor=float(weight_factor),
        inv_total=1.0 / (b * q_count),
        tile_rows=tile_rows,
        valid_rows=rows,
        needs_mask=needs_mask,
    )

    in_map = lambda i: (i, 0)
    out = pl.pallas_call(
        kernel,
        out_shape=jax.ShapeDtypeStruct((1, 1), jnp.float32),
        grid_spec=pltpu.PrefetchScalarGridSpec(
            num_scalar_prefetch=0,
            grid=(n_tiles,),
            in_specs=[
                pl.BlockSpec((tile_rows, _LANES), in_map),
                pl.BlockSpec((tile_rows, _LANES), in_map),
            ],
            out_specs=pl.BlockSpec((1, 1), lambda i: (0, 0)),
            scratch_shapes=[pltpu.VMEM((8, _LANES), jnp.float32)],
        ),
        compiler_params=pltpu.CompilerParams(
            dimension_semantics=("arbitrary",),
            vmem_limit_bytes=_VMEM_LIMIT_BYTES),
    )(pred2, target2)

    return out[0, 0]


def _reference(pred, target, quantiles=QUANTILES,
               threshold=THRESHOLD, weight_factor=WEIGHT_FACTOR):
    pred = pred.astype(jnp.float32)
    target = target.astype(jnp.float32)
    weights = jnp.where(jnp.abs(target) > threshold, weight_factor, 1.0)
    errors = target - pred
    losses = []
    for q in quantiles:
        q_loss = jnp.maximum(q * errors, (q - 1.0) * errors)
        losses.append(jnp.mean(weights * q_loss))
    return sum(losses) / len(losses)


if __name__ == "__main__":
    key = jax.random.PRNGKey(0)
    k1, k2, k3, k4 = jax.random.split(key, 4)

    # Small case consistent with [batch_size, 1] inputs.
    batch = 128
    pred = 0.05 * jax.random.normal(k1, (batch, 1), dtype=jnp.float32)
    target = 0.05 * jax.random.normal(k2, (batch, 1), dtype=jnp.float32)
    loss = jax.block_until_ready(weighted_quantile_loss(pred, target))
    ref = _reference(pred, target)
    assert jnp.allclose(loss, ref, rtol=1e-4, atol=1e-6), (loss, ref)

    # bf16 inputs (cast to f32 inside the kernel, matching the reference path).
    loss_bf16 = jax.block_until_ready(
        weighted_quantile_loss(pred.astype(jnp.bfloat16),
                               target.astype(jnp.bfloat16)))
    ref_bf16 = _reference(pred.astype(jnp.bfloat16), target.astype(jnp.bfloat16))
    assert jnp.allclose(loss_bf16, ref_bf16, rtol=1e-4, atol=1e-6), (loss_bf16, ref_bf16)

    # Non-multiple-of-128 batch exercises the minimal padding + vreg accumulator.
    batch2 = 1000
    pred2 = 0.05 * jax.random.normal(k3, (batch2, 1), dtype=jnp.float32)
    target2 = 0.05 * jax.random.normal(k4, (batch2, 1), dtype=jnp.float32)
    loss2 = jax.block_until_ready(weighted_quantile_loss(pred2, target2))
    ref2 = _reference(pred2, target2)
    assert jnp.allclose(loss2, ref2, rtol=1e-4, atol=1e-6), (loss2, ref2)

    print("KERNEL_OK")
</pallas_src>

<mosaic_0001>
module attributes {stable_mosaic.version = 11 : i64} {
  func.func @kernel(%arg0: i32, %arg1: memref<1x128xf32, #tpu.memory_space<vmem>>, %arg2: memref<1x128xf32, #tpu.memory_space<vmem>>, %arg3: memref<1x1xf32, #tpu.memory_space<vmem>>, %arg4: memref<8x128xf32, #tpu.memory_space<vmem>>) attributes {dimension_semantics = [#tpu.dimension_semantics<arbitrary>], iteration_bounds = array<i64: 1>, scalar_prefetch = 0 : i64, scratch_operands = 1 : i64, tpu.core_type = #tpu.core_type<tc>, window_params = [{transform_indices = @transform_0, window_bounds = array<i64: 1, 128>}, {transform_indices = @transform_1, window_bounds = array<i64: 1, 128>}, {pipeline_mode = #tpu.pipeline_mode<synchronous>, transform_indices = @transform_2, window_bounds = array<i64: 1, 1>}]} {
    %c0_i32 = arith.constant 0 : i32
    %0 = arith.cmpi eq, %arg0, %c0_i32 : i32
    %1 = arith.extui %0 : i1 to i32
    %c0_i32_0 = arith.constant 0 : i32
    %2 = arith.cmpi ne, %1, %c0_i32_0 : i32
    scf.if %2 {
      %cst_17 = arith.constant 0.000000e+00 : f32
      %33 = vector.broadcast %cst_17 : f32 to vector<8x128xf32>
      %c0_18 = arith.constant 0 : index
      %c0_19 = arith.constant 0 : index
      %34 = vector.load %arg4[%c0_18, %c0_19] : memref<8x128xf32, #tpu.memory_space<vmem>>, vector<8x128xf32>
      tpu.vector_store %arg4[%c0_18, %c0_19], %33 {strides = array<i32>} : memref<8x128xf32, #tpu.memory_space<vmem>>, vector<8x128xf32>,
    } else {
    }
    %c0 = arith.constant 0 : index
    %c0_1 = arith.constant 0 : index
    %3 = vector.load %arg1[%c0, %c0_1] : memref<1x128xf32, #tpu.memory_space<vmem>>, vector<1x128xf32>
    %c0_2 = arith.constant 0 : index
    %c0_3 = arith.constant 0 : index
    %4 = vector.load %arg2[%c0_2, %c0_3] : memref<1x128xf32, #tpu.memory_space<vmem>>, vector<1x128xf32>
    %5 = arith.subf %4, %3 : vector<1x128xf32>
    %6 = math.absf %4 : vector<1x128xf32>
    %cst = arith.constant 3.000000e-02 : f32
    %7 = vector.broadcast %cst : f32 to vector<1x128xf32>
    %8 = arith.cmpf ogt, %6, %7 : vector<1x128xf32>
    %cst_4 = arith.constant 3.000000e+00 : f32
    %cst_5 = arith.constant 1.000000e+00 : f32
    %9 = vector.broadcast %cst_4 : f32 to vector<1x128xf32>
    %10 = vector.broadcast %cst_5 : f32 to vector<1x128xf32>
    %11 = arith.select %8, %9, %10 : vector<1x128xi1>, vector<1x128xf32>
    %cst_6 = arith.constant 1.500000e+00 : f32
    %12 = vector.broadcast %cst_6 : f32 to vector<1x128xf32>
    %13 = arith.mulf %12, %5 : vector<1x128xf32>
    %cst_7 = arith.constant 0.000000e+00 : f32
    %14 = vector.broadcast %cst_7 : f32 to vector<1x128xf32>
    %15 = arith.subf %14, %5 : vector<1x128xf32>
    %cst_8 = arith.constant 0.000000e+00 : f32
    %16 = vector.broadcast %cst_8 : f32 to vector<1x128xf32>
    %17 = arith.maximumf %15, %16 : vector<1x128xf32>
    %cst_9 = arith.constant 3.000000e+00 : f32
    %18 = vector.broadcast %cst_9 : f32 to vector<1x128xf32>
    %19 = arith.mulf %18, %17 : vector<1x128xf32>
    %20 = arith.addf %13, %19 : vector<1x128xf32>
    %21 = arith.mulf %11, %20 : vector<1x128xf32>
    %c0_10 = arith.constant 0 : index
    %c0_11 = arith.constant 0 : index
    %22 = vector.load %arg4[%c0_10, %c0_11] : memref<8x128xf32, #tpu.memory_space<vmem>>, vector<1x1xf32>
    %23 = vector.shape_cast %21 : vector<1x128xf32> to vector<1x1x128xf32>
    %cst_12 = arith.constant dense<0.000000e+00> : vector<1xf32>
    %24 = vector.multi_reduction <add>, %23, %cst_12 [1, 2] : vector<1x1x128xf32> to vector<1xf32>
    %25 = vector.shape_cast %24 : vector<1xf32> to vector<1x1x1xf32>
    %26 = vector.extract %25[0, 0, 0] : f32 from vector<1x1x1xf32>
    %27 = vector.broadcast %26 : f32 to vector<1x1xf32>
    %28 = arith.addf %22, %27 : vector<1x1xf32>
    %c0_13 = arith.constant 0 : index
    %c0_14 = arith.constant 0 : index
    %29 = vector.load %arg4[%c0_13, %c0_14] : memref<8x128xf32, #tpu.memory_space<vmem>>, vector<1x1xf32>
    tpu.vector_store %arg4[%c0_13, %c0_14], %28 {strides = array<i32>} : memref<8x128xf32, #tpu.memory_space<vmem>>, vector<1x1xf32>,
    %c0_i32_15 = arith.constant 0 : i32
    %30 = arith.cmpi eq, %arg0, %c0_i32_15 : i32
    %31 = arith.extui %30 : i1 to i32
    %c0_i32_16 = arith.constant 0 : i32
    %32 = arith.cmpi ne, %31, %c0_i32_16 : i32
    scf.if %32 {
      %c0_17 = arith.constant 0 : index
      %c0_18 = arith.constant 0 : index
      %33 = vector.load %arg4[%c0_17, %c0_18] : memref<8x128xf32, #tpu.memory_space<vmem>>, vector<8x128xf32>
      %34 = vector.shape_cast %33 : vector<8x128xf32> to vector<1x8x128xf32>
      %cst_19 = arith.constant dense<0.000000e+00> : vector<1xf32>
      %35 = vector.multi_reduction <add>, %34, %cst_19 [1, 2] : vector<1x8x128xf32> to vector<1xf32>
      %36 = vector.shape_cast %35 : vector<1xf32> to vector<1x1x1xf32>
      %37 = vector.extract %36[0, 0, 0] : f32 from vector<1x1x1xf32>
      %38 = vector.broadcast %37 : f32 to vector<1x1xf32>
      %cst_20 = arith.constant 0.00260416674 : f32
      %39 = vector.broadcast %cst_20 : f32 to vector<1x1xf32>
      %40 = arith.mulf %38, %39 : vector<1x1xf32>
      %c0_21 = arith.constant 0 : index
      %c0_22 = arith.constant 0 : index
      %41 = vector.load %arg3[%c0_21, %c0_22] : memref<1x1xf32, #tpu.memory_space<vmem>>, vector<1x1xf32>
      tpu.vector_store %arg3[%c0_21, %c0_22], %40 {strides = array<i32>} : memref<1x1xf32, #tpu.memory_space<vmem>>, vector<1x1xf32>,
    } else {
    }
    return
  }
  func.func @transform_0(%arg0: i32) -> (i32, i32) {
    %c0_i32 = arith.constant 0 : i32
    %c0_i32_0 = arith.constant 0 : i32
    return %arg0, %c0_i32 : i32, i32
  }
  func.func @transform_1(%arg0: i32) -> (i32, i32) {
    %c0_i32 = arith.constant 0 : i32
    %c0_i32_0 = arith.constant 0 : i32
    return %arg0, %c0_i32 : i32, i32
  }
  func.func @transform_2(%arg0: i32) -> (i32, i32) {
    %c0_i32 = arith.constant 0 : i32
    %c0_i32_0 = arith.constant 0 : i32
    %c0_i32_1 = arith.constant 0 : i32
    return %c0_i32, %c0_i32_0 : i32, i32
  }
}

</mosaic_0001>

<bundles_post_ra>
// kernel: tpu_custom_call.1
= control target key start
LH: loop header
LB: loop body
LE: loop exit
PB: predicated region body
PF: predicated region fallthrough
CT: control target
= control target key end

     0   :  { %7 = vsyncpa [#allocation4], 0  ;;  %s192_s0 = inlined_call_operand.hbm [shape: f32[1,128], index: 0, kind: input, shape index: {}]   ;;  %s193_s1 = inlined_call_operand.vmem [shape: f32[1,128], index: 1, kind: input, shape index: {}]   ;;  %s194_s2 = inlined_call_operand.hbm [shape: f32[1,1], index: 2, kind: output, shape index: {}]  }
   0x1   :  { %8 = vsyncpa [#allocation5], 0  ;;  %s144_s9 = smov [#allocation3]   ;;  %s96_s13 = scalar_lea.hbm %s192_s0, 16 }
   0x2   :  { %s15_s10 = sshll.u32 %s144_s9, 4  ;;  %p97_p0 = scmp.ne.s32.totalorder %s192_s0, %s96_s13  ;;  %s16_s10 = int_to_ptr.vmem [resolvable:$true] %s15_s10 }
   0x3   :  { %p100_p1 = scmp.lt.u32.totalorder %s96_s13, %s192_s0 }
   0x5   :  { %p102_p2 = pnand %p100_p1, %p97_p0 }
   0x7   :  { %105 = shalt.err (!%p102_p2)
}
   0x8   :  { %s106_s18 = scalar_lea.vmem %s16_s10, 16  ;;  %s110_s19 = scalar_lea.vmem %s16_s10, 32 }
   0x9   :  { %p107_p3 = scmp.ne.s32.totalorder %s16_s10, %s106_s18  ;;  %p111_p4 = scmp.lt.s32.totalorder %s16_s10, %s16_s10 }
   0xa   :  { %p112_p5 = scmp.lt.s32.totalorder %s110_s19, %s106_s18 }
   0xc   :  { %p113_p6 = por %p112_p5, %p111_p4 }
   0xe   :  { %p114_p7 = pnand %p113_p6, %p107_p3 }
  0x10   :  { %117 = shalt.err (!%p114_p7)
}
  0x11   :  { %18 = dma.hbm_to_vmem [thread:$0]  %s192_s0, 16, %s16_s10, [#allocation4]  }
  0x12   :  { %140 = dma.done.wait [#allocation4], 16  }
  0x13   :  { %141 = vsyncadd [#allocation4], 4294967280  ;;  %v29_v0 = vld [vmem:[#allocation3] sm:$0x1]  ;;  %v30_v1 = vld [vmem:[%s193_s1] sm:$0x1] }
  0x14   :  { %v31_v2 = vsub.f32 %v30_v1, %v29_v0  ;;  %v32_v3 = vand.u32 2147483647, %v30_v1  ;;  %v145_v8 = vmov 1.0   ;;  %vm42_vm1 = vcmask 1040384   ;;  %s147_s1 = smov [#allocation6]  }
  0x15   :  { %v146_v13 = vmov 0.0   ;;  %vm55_vm2 = vcmask 0   ;;  %s79_s24 = sshll.u32 %s147_s1, 4  ;;  %s80_s24 = int_to_ptr.vmem [resolvable:$true] %s79_s24 }
  0x16   :  { %v36_v4 = vsub.f32 0.0, %v31_v2  ;;  %vm33_vm0 = vcmp.gt.f32.partialorder %v32_v3, 0.03  ;;  %v35_v5 = vmul.f32 1.5, %v31_v2  ;;  %28 = vst [vmem:[#allocation2] sm:$0xff] %v146_v13  ;;  %s118_s26 = scalar_lea.vmem %s80_s24, 16  ;;  %p123_p9 = scmp.lt.s32.totalorder %s80_s24, %s80_s24 }
  0x17   :  { %v34_v9 = vsel %vm33_vm0, 3.0, %v145_v8  ;;  %p119_p8 = scmp.ne.s32.totalorder %s80_s24, %s118_s26  ;;  %s122_s27 = scalar_lea.vmem %s80_s24, 32 }
  0x18   :  { %v37_v6 = vmax.f32 %v36_v4, 0.0  ;;  %p124_p10 = scmp.lt.s32.totalorder %s122_s27, %s118_s26 }
  0x1a   :  { %v38_v7 = vmul.f32 3.0, %v37_v6  ;;  %p125_p11 = por %p124_p10, %p123_p9 }
  0x1c   :  { %v39_v10 = vadd.f32 %v38_v7, %v35_v5  ;;  %p126_p12 = pnand %p125_p11, %p119_p8 }
  0x1d   :  { %v41_v21 = vld [vmem:[#allocation2] sm:$0x1] }
  0x1e   :  { %v40_v11 = vmul.f32 %v39_v10, %v34_v9 }
  0x20   :  { %v43_v12 = vsel %vm42_vm1, %v40_v11, 0.0 }
  0x21   :  { %44 = vadd.xlane.f32.xlu0 %v43_v12 }
  0xae   :  { %v45_v14 = vpop.xlane.xlu0 %44 }
  0xaf   :  { %v46_v15 = vrot.slane %v45_v14, 4 }
  0xb1   :  { %v47_v16 = vadd.f32 %v46_v15, %v45_v14 }
  0xb3   :  { %v48_v17 = vrot.slane %v47_v16, 2 }
  0xb5   :  { %v49_v18 = vadd.f32 %v48_v17, %v47_v16 }
  0xb7   :  { %v50_v19 = vrot.slane %v49_v18, 1 }
  0xb9   :  { %v51_v20 = vadd.f32 %v50_v19, %v49_v18 }
  0xbb   :  { %88 = vpush %v51_v20 }
  0xec   :  { %s89_s0 = spop %88 }
  0xed   :  { %v53_v22 = vstv %s89_s0 }
  0xee   :  { %v54_v23 = vadd.f32 %v53_v22, %v41_v21 }
  0xf0   :  { %56 = vst.msk [vmem:[#allocation2] sm:$0x1] %vm55_vm2, %v54_v23 }
  0xf7   :  { %v60_v24 = vld [vmem:[#allocation2] sm:$0xff] }
  0xf8   :  { %61 = vadd.xlane.f32.xlu0 %v60_v24 }
 0x185   :  { %v62_v25 = vpop.xlane.xlu0 %61 }
 0x186   :  { %v63_v26 = vrot.slane %v62_v25, 4 }
 0x188   :  { %v64_v27 = vadd.f32 %v63_v26, %v62_v25 }
 0x18a   :  { %v65_v28 = vrot.slane %v64_v27, 2 }
 0x18c   :  { %v66_v29 = vadd.f32 %v65_v28, %v64_v27 }
 0x18e   :  { %v67_v30 = vrot.slane %v66_v29, 1 }
 0x190   :  { %v68_v31 = vadd.f32 %v67_v30, %v66_v29 }
 0x192   :  { %90 = vpush %v68_v31 }
 0x1c3   :  { %s91_s25 = spop %90 }
 0x1c4   :  { %v70_v32 = vstv %s91_s25 }
 0x1c5   :  { %v71_v33 = vmul.f32 0.0026041667, %v70_v32 }
 0x1c7   :  { %72 = vst.msk [vmem:[#allocation6] sm:$0x1] %vm55_vm2, %v71_v33 }
 0x1c8   :  { %129 = shalt.err (!%p126_p12)
}
 0x1c9   :  { %s130_s30 = scalar_lea.hbm %s194_s2, 16 }
 0x1ca   :  { %p131_p13 = scmp.ne.s32.totalorder %s194_s2, %s130_s30  ;;  %p134_p0 = scmp.lt.u32.totalorder %s130_s30, %s194_s2 }
 0x1cc   :  { %p136_p1 = pnand %p134_p0, %p131_p13 }
 0x1ce   :  { %139 = shalt.err (!%p136_p1)
}
 0x1cf   :  { %82 = dma.vmem_to_hbm [thread:$0]  %s80_s24, 16, %s194_s2, [#allocation5]  }
 0x1d0   :  { %142 = dma.done.wait [#allocation5], 16  }
 0x1d1   :  { %143 = vsyncadd [#allocation5], 4294967280 }
 0x1d2   :  { %86 = vsyncpa [#allocation4], 1 }
 0x1d3   :  { %87 = vsyncpa [#allocation5], 1 }

</bundles_post_ra>
